<compile_context>
chip_gen: v7x
topology: tpu7x:2x2x1
jax: 0.10.0
libtpu: 0.0.40
codegen_flags: <defaults>
</compile_context>

<pallas_src>
import numpy as np

import jax
import jax.numpy as jnp
from jax.experimental import pallas as pl
from jax.experimental.pallas import tpu as pltpu

_EPS = 1e-12
_LANE = 128


# ------------------------------- helpers ------------------------------------

def _maybe_pad_lanes(w):
    """Only round the output dim up to a multiple of 128 when it is already
    >= 128 (real CLIP D=512 is a no-op); small D stays unpadded -- the
    full-array-dim BlockSpec exception keeps blocks legal and avoids 4x
    weight streaming / MXU work."""
    k, d = w.shape
    if d < _LANE or d % _LANE == 0:
        return w
    dp = pl.cdiv(d, _LANE) * _LANE
    return jnp.pad(w, ((0, 0), (0, dp - d)))


def _vmem_budgets():
    """(tiling budget, explicit vmem_limit_bytes) derived from the chip's
    physical VMEM (64 MiB/TC on v7x, 128 MiB on v5e/v6e)."""
    cap = 128 << 20
    try:
        cap = int(getattr(pltpu.get_tpu_info(), "vmem_capacity_bytes", cap))
    except Exception:
        pass
    vmem_limit = (cap * 3) // 4          # ~96 MiB v5e/v6e, ~48 MiB v7x
    tile_budget = (cap * 3) // 5         # headroom under the limit
    return tile_budget, vmem_limit


def _choose_tb(batch, frames, max_rows=1024):
    """Batch tile: whole batch when small; else a divisor of `batch` that is a
    multiple of 8 (legal unmasked (tb, D) output blocks); else whole batch."""
    if batch * frames <= max_rows:
        return batch
    for tb in range(min(batch, max(1, max_rows // frames)), 0, -1):
        if batch % tb == 0 and tb % 8 == 0:
            return tb
    return batch


def _choose_tk(tm, tb, k, d, budget):
    """Largest K tile whose blocks fit the budget.

    Cost model: double-buffered f32 x block (cast to bf16 in-kernel) +
    double-buffered bf16 w block + double-buffered f32 (tb, d) out block +
    single-buffered f32 (tm, d) accumulator (only when K is tiled).
    Returns (tk, k_padded); k_padded > k only in the zero-pad fallback."""
    out_bytes = 2 * 4 * tb * d
    acc_bytes = 4 * tm * d

    def cost(tk, tiled):
        c = 2 * 4 * tm * tk + 2 * 2 * tk * d + out_bytes
        return c + (acc_bytes if tiled else 0)

    if cost(k, False) <= budget:
        return k, k                        # whole K resident -> no reduction grid

    per_col = 2 * 4 * tm + 2 * 2 * d
    max_tk = max(_LANE, (budget - out_bytes - acc_bytes) // per_col)
    tk_cap = max(_LANE, (max_tk // _LANE) * _LANE)

    # Prefer a divisor of K (multiple of 128) -> no padding at all.
    best = 0
    i = 1
    while i * i <= k:
        if k % i == 0:
            for dv in (i, k // i):
                if dv % _LANE == 0 and dv <= tk_cap and dv > best:
                    best = dv
        i += 1
    if best:
        return best, k
    # Fallback: zero-pad K up to a multiple of tk_cap (zero rows/cols are
    # exact no-ops in the dot).  TODO(synk): masked remainder tile instead.
    return tk_cap, pl.cdiv(k, tk_cap) * tk_cap


def _pool_matrix(tb, frames):
    """(tb, tb*frames) mean-pool matrix: row b averages rows b*T..(b+1)*T-1.
    Built once per call shape with numpy and passed as a tiny VMEM input."""
    return jnp.asarray(np.kron(np.eye(tb, dtype=np.float32),
                               np.full((1, frames), 1.0 / frames, np.float32)))


# ----------------------------- Pallas kernels --------------------------------

def _video_epilogue(feats, pool, o_ref):
    """feats: (tm, D) f32 per-frame features; pool: (tb, tm) f32.

    Per-frame L2 normalize -> temporal mean pool (module's mask is all ones)
    -> final L2 normalize, written to o_ref (tb, D)."""
    f = feats * jax.lax.rsqrt(
        jnp.sum(feats * feats, axis=-1, keepdims=True) + _EPS)
    v = jnp.dot(pool, f, preferred_element_type=jnp.float32)       # (tb, D)
    v = v * jax.lax.rsqrt(jnp.sum(v * v, axis=-1, keepdims=True) + _EPS)
    o_ref[...] = v.astype(o_ref.dtype)


def _make_video_kernel(k_tiled):
    if not k_tiled:
        # Whole K resident: single matmul, no accumulator, fused epilogue.
        def kernel(x_ref, w_ref, pool_ref, o_ref):
            feats = jnp.dot(x_ref[...].astype(jnp.bfloat16), w_ref[...],
                            preferred_element_type=jnp.float32)
            _video_epilogue(feats, pool_ref[...], o_ref)
        return kernel

    def kernel(x_ref, w_ref, pool_ref, o_ref, acc_ref):
        @pl.when(pl.program_id(1) == 0)
        def _():
            acc_ref[...] = jnp.zeros_like(acc_ref)

        acc_ref[...] += jnp.dot(x_ref[...].astype(jnp.bfloat16), w_ref[...],
                                preferred_element_type=jnp.float32)

        @pl.when(pl.program_id(1) == pl.num_programs(1) - 1)
        def _():
            _video_epilogue(acc_ref[...], pool_ref[...], o_ref)

    return kernel


def _make_text_kernel(seq_len):
    """Fused text path: SMEM token ids -> gather rows of the VMEM-resident
    embedding table -> mean pool -> bf16 projection matmul -> L2 normalize."""
    inv_len = 1.0 / float(seq_len)

    def kernel(ids_ref, emb_ref, w_ref, o_ref):
        e = emb_ref.shape[1]
        acc = jnp.zeros((1, e), jnp.float32)
        for i in range(seq_len):                       # static, tiny L
            acc = acc + emb_ref[pl.ds(ids_ref[i], 1), :]
        pooled = (acc * inv_len).astype(jnp.bfloat16)
        f = jnp.dot(pooled, w_ref[...], preferred_element_type=jnp.float32)
        o_ref[...] = f * jax.lax.rsqrt(
            jnp.sum(f * f, axis=-1, keepdims=True) + _EPS)

    return kernel


# ------------------------------ call wrappers --------------------------------

def pallas_video_forward(frames2d, w_vis, batch, frames, d_out):
    """frames2d: (batch*frames, K) f32; w_vis: (K, D) bf16.

    Returns (batch, d_out) L2-normalized video embeddings."""
    m, k = frames2d.shape
    kw, d = w_vis.shape
    assert k == kw and m == batch * frames

    budget, vmem_limit = _vmem_budgets()
    tb = _choose_tb(batch, frames)
    tm = tb * frames
    nb = batch // tb
    tk, k_pad = _choose_tk(tm, tb, k, d, budget)
    nk = k_pad // tk

    x, w = frames2d, w_vis
    if k_pad != k:
        # zero columns/rows contribute nothing to the dot
        x = jnp.pad(x, ((0, 0), (0, k_pad - k)))
        w = jnp.pad(w, ((0, k_pad - k), (0, 0)))

    pool = _pool_matrix(tb, frames)

    if nk == 1:
        grid = (nb,)
        in_specs = [pl.BlockSpec((tm, k_pad), lambda i: (i, 0)),
                    pl.BlockSpec((k_pad, d), lambda i: (0, 0)),   # weight resident
                    pl.BlockSpec((tb, tm), lambda i: (0, 0))]
        out_specs = pl.BlockSpec((tb, d), lambda i: (i, 0))
        scratch = []
        dims = ("parallel",)
    else:
        grid = (nb, nk)
        in_specs = [pl.BlockSpec((tm, tk), lambda i, kk: (i, kk)),
                    pl.BlockSpec((tk, d), lambda i, kk: (kk, 0)),
                    pl.BlockSpec((tb, tm), lambda i, kk: (0, 0))]
        out_specs = pl.BlockSpec((tb, d), lambda i, kk: (i, 0))
        scratch = [pltpu.VMEM((tm, d), jnp.float32)]
        dims = ("parallel", "arbitrary")

    out = pl.pallas_call(
        _make_video_kernel(nk > 1),
        out_shape=jax.ShapeDtypeStruct((batch, d), jnp.float32),
        grid_spec=pltpu.PrefetchScalarGridSpec(
            num_scalar_prefetch=0,
            grid=grid,
            in_specs=in_specs,
            out_specs=out_specs,
            scratch_shapes=scratch),
        compiler_params=pltpu.CompilerParams(
            dimension_semantics=dims,
            vmem_limit_bytes=int(vmem_limit)),
    )(x, w, pool)
    return out[:, :d_out]


def pallas_text_forward(text_ids_row, tok_emb, w_txt, d_out):
    """text_ids_row: (L,) int32; tok_emb: (V, E) f32 (small, VMEM-resident);
    w_txt: (E, Dp) bf16 -> (d_out,) normalized text embedding, one launch."""
    seq_len = int(text_ids_row.shape[0])
    dp = w_txt.shape[1]
    # TODO(synk): for a large vocab keep tok_emb in HBM and DMA-gather rows.
    out = pl.pallas_call(
        _make_text_kernel(seq_len),
        out_shape=jax.ShapeDtypeStruct((1, dp), jnp.float32),
        in_specs=[pl.BlockSpec(memory_space=pltpu.MemorySpace.SMEM),   # ids
                  pl.BlockSpec(memory_space=pltpu.MemorySpace.VMEM),   # tok_emb
                  pl.BlockSpec(memory_space=pltpu.MemorySpace.VMEM)],  # w_txt
        out_specs=pl.BlockSpec(memory_space=pltpu.MemorySpace.VMEM),
    )(text_ids_row.astype(jnp.int32), tok_emb, w_txt)
    return out[0, :d_out]


# --------------------------- module-level wrapper ----------------------------

class CLIP4ClipPallas:
    """Mirrors CLIP4Clip.forward(data, modality) with Pallas-backed compute."""

    def __init__(self, w_vis, tok_emb, w_txt):
        self.d = w_vis.shape[1]
        # Weights cast to bf16 once (MXU-native); output dim only rounded up
        # when it is already >= 128 (no padding for small D).
        self.w_vis = _maybe_pad_lanes(w_vis).astype(jnp.bfloat16)   # (C*H*W, Dp)
        self.w_txt = _maybe_pad_lanes(w_txt).astype(jnp.bfloat16)   # (E, Dp)
        self.tok_emb = tok_emb.astype(jnp.float32)                  # (VOCAB, E)

    def __call__(self, data, modality):
        if modality == 'video':
            return self._inference_from_video(data)
        elif modality == 'text':
            return self._inference_from_text(data)
        else:
            raise ValueError('modality[{}] not implemented.'.format(modality))

    def _inference_from_video(self, video):
        b, ts, c, h, w = video.shape
        frames = video.reshape(b * ts, c * h * w)   # view(b*ts,c,h,w) + flatten
        # Single fused Pallas kernel: frame matmul -> per-frame L2 normalize ->
        # temporal mean pool (module's mask is all ones) -> final L2 normalize.
        return pallas_video_forward(frames, self.w_vis, b, ts, self.d)

    def _inference_from_text(self, text_ids):
        # get_sequence_output (synthetic): embed -> mean pool -> proj -> L2
        # normalize, all inside one fused Pallas kernel (ids in SMEM).
        return pallas_text_forward(text_ids[0], self.tok_emb, self.w_txt, self.d)


# ----------------------------------- main ------------------------------------

if __name__ == "__main__":
    key = jax.random.PRNGKey(0)
    k_vid, k_txt, k_wv, k_emb, k_wt = jax.random.split(key, 5)

    B, T, C, H, W = 2, 4, 4, 16, 16   # batch, frames, channels, height, width
    D = 32                            # output embedding dim
    L = 8                             # text sequence length
    VOCAB, E = 100, 64                # synthetic vocab / text embedding width

    # Deterministic synthetic parameters
    w_vis = jax.random.normal(k_wv, (C * H * W, D), dtype=jnp.float32) * 0.02
    tok_emb = jax.random.normal(k_emb, (VOCAB, E), dtype=jnp.float32) * 0.02
    w_txt = jax.random.normal(k_wt, (E, D), dtype=jnp.float32) * 0.02

    # Deterministic example inputs
    video = jax.random.normal(k_vid, (B, T, C, H, W), dtype=jnp.float32)
    text_ids = jax.random.randint(k_txt, (1, L), 0, VOCAB, dtype=jnp.int32)

    model = CLIP4ClipPallas(w_vis, tok_emb, w_txt)

    vid_vec = model(video, 'video')
    txt_vec = model(text_ids, 'text')
    jax.block_until_ready(vid_vec)
    jax.block_until_ready(txt_vec)

    # Pure-JAX references with bf16-quantized matmul inputs (the kernels feed
    # the MXU bf16 and accumulate in f32).
    def bf16(x):
        return x.astype(jnp.bfloat16).astype(jnp.float32)

    def ref_video(video, w_vis):
        b, ts, c, h, w = video.shape
        f = bf16(video.reshape(b * ts, c * h * w)) @ bf16(w_vis)
        f = f.reshape(b, ts, -1)
        f = f / jnp.linalg.norm(f, axis=-1, keepdims=True)
        m = jnp.ones((b, ts, 1), jnp.float32)
        f = f * m
        msum = jnp.sum(m, axis=1)
        msum = jnp.where(msum == 0.0, 1.0, msum)
        v = jnp.sum(f, axis=1) / msum
        return v / jnp.linalg.norm(v, axis=-1, keepdims=True)

    def ref_text(tok_emb, text_ids, w_txt):
        emb = jnp.take(tok_emb, text_ids[0], axis=0)
        pooled = jnp.mean(emb, axis=0, keepdims=True)
        f = bf16(pooled) @ bf16(w_txt)
        f = f / jnp.linalg.norm(f, axis=-1, keepdims=True)
        return f.reshape(-1)

    ref_v = ref_video(video, w_vis)
    ref_t = ref_text(tok_emb, text_ids, w_txt)

    assert vid_vec.shape == (B, D)
    assert txt_vec.shape == (D,)
    assert jnp.allclose(vid_vec, ref_v, atol=2e-3, rtol=2e-3), \
        float(jnp.max(jnp.abs(vid_vec - ref_v)))
    assert jnp.allclose(txt_vec, ref_t, atol=2e-3, rtol=2e-3), \
        float(jnp.max(jnp.abs(txt_vec - ref_t)))
    assert jnp.allclose(jnp.linalg.norm(vid_vec, axis=-1), 1.0, atol=1e-3)
    assert jnp.allclose(jnp.linalg.norm(txt_vec), 1.0, atol=1e-3)

    print("KERNEL_OK")
</pallas_src>

<mosaic_0001>
module attributes {stable_mosaic.version = 11 : i64} {
  func.func @kernel(%arg0: i32, %arg1: memref<8x1024xf32, #tpu.memory_space<vmem>>, %arg2: memref<1024x32xbf16, #tpu.memory_space<vmem>>, %arg3: memref<2x8xf32, #tpu.memory_space<vmem>>, %arg4: memref<2x32xf32, #tpu.memory_space<vmem>>) attributes {dimension_semantics = [#tpu.dimension_semantics<parallel>], iteration_bounds = array<i64: 1>, scalar_prefetch = 0 : i64, scratch_operands = 0 : i64, tpu.core_type = #tpu.core_type<tc>, window_params = [{transform_indices = @transform_0, window_bounds = array<i64: 8, 1024>}, {pipeline_mode = #tpu.pipeline_mode<synchronous>, transform_indices = @transform_1, window_bounds = array<i64: 1024, 32>}, {pipeline_mode = #tpu.pipeline_mode<synchronous>, transform_indices = @transform_2, window_bounds = array<i64: 2, 8>}, {transform_indices = @transform_3, window_bounds = array<i64: 2, 32>}]} {
    %c0 = arith.constant 0 : index
    %c0_0 = arith.constant 0 : index
    %0 = vector.load %arg1[%c0, %c0_0] : memref<8x1024xf32, #tpu.memory_space<vmem>>, vector<8x1024xf32>
    %1 = arith.truncf %0 : vector<8x1024xf32> to vector<8x1024xbf16>
    %c0_1 = arith.constant 0 : index
    %c0_2 = arith.constant 0 : index
    %2 = vector.load %arg2[%c0_1, %c0_2] : memref<1024x32xbf16, #tpu.memory_space<vmem>>, vector<1024x32xbf16>
    %cst = arith.constant dense<0.000000e+00> : vector<8x32xf32>
    %3 = tpu.matmul %1, %2, %cst {dimension_numbers = #tpu.dot_dimension_numbers<[1], [0], [0], [1], [0, 0, 1, 1], [], []>} : vector<8x1024xbf16>, vector<1024x32xbf16>, vector<8x32xf32> -> vector<8x32xf32>
    %c0_3 = arith.constant 0 : index
    %c0_4 = arith.constant 0 : index
    %4 = vector.load %arg3[%c0_3, %c0_4] : memref<2x8xf32, #tpu.memory_space<vmem>>, vector<2x8xf32>
    %5 = arith.mulf %3, %3 : vector<8x32xf32>
    %cst_5 = arith.constant dense<0.000000e+00> : vector<8xf32>
    %6 = vector.multi_reduction <add>, %5, %cst_5 [1] : vector<8x32xf32> to vector<8xf32>
    %7 = vector.shape_cast %6 : vector<8xf32> to vector<8x1xf32>
    %cst_6 = arith.constant 9.99999996E-13 : f32
    %8 = vector.broadcast %cst_6 : f32 to vector<8x1xf32>
    %9 = arith.addf %7, %8 : vector<8x1xf32>
    %10 = math.rsqrt %9 : vector<8x1xf32>
    %11 = vector.broadcast %10 : vector<8x1xf32> to vector<8x32xf32>
    %12 = arith.mulf %3, %11 : vector<8x32xf32>
    %cst_7 = arith.constant dense<0.000000e+00> : vector<2x32xf32>
    %13 = tpu.matmul %4, %12, %cst_7 {dimension_numbers = #tpu.dot_dimension_numbers<[1], [0], [0], [1], [0, 0, 1, 1], [], []>} : vector<2x8xf32>, vector<8x32xf32>, vector<2x32xf32> -> vector<2x32xf32>
    %14 = arith.mulf %13, %13 : vector<2x32xf32>
    %cst_8 = arith.constant dense<0.000000e+00> : vector<2xf32>
    %15 = vector.multi_reduction <add>, %14, %cst_8 [1] : vector<2x32xf32> to vector<2xf32>
    %16 = vector.shape_cast %15 : vector<2xf32> to vector<2x1xf32>
    %cst_9 = arith.constant 9.99999996E-13 : f32
    %17 = vector.broadcast %cst_9 : f32 to vector<2x1xf32>
    %18 = arith.addf %16, %17 : vector<2x1xf32>
    %19 = math.rsqrt %18 : vector<2x1xf32>
    %20 = vector.broadcast %19 : vector<2x1xf32> to vector<2x32xf32>
    %21 = arith.mulf %13, %20 : vector<2x32xf32>
    %c0_10 = arith.constant 0 : index
    %c0_11 = arith.constant 0 : index
    %22 = vector.load %arg4[%c0_10, %c0_11] : memref<2x32xf32, #tpu.memory_space<vmem>>, vector<2x32xf32>
    tpu.vector_store %arg4[%c0_10, %c0_11], %21 {strides = array<i32>} : memref<2x32xf32, #tpu.memory_space<vmem>>, vector<2x32xf32>,
    return
  }
  func.func @transform_0(%arg0: i32) -> (i32, i32) {
    %c0_i32 = arith.constant 0 : i32
    %c0_i32_0 = arith.constant 0 : i32
    return %arg0, %c0_i32 : i32, i32
  }
  func.func @transform_1(%arg0: i32) -> (i32, i32) {
    %c0_i32 = arith.constant 0 : i32
    %c0_i32_0 = arith.constant 0 : i32
    %c0_i32_1 = arith.constant 0 : i32
    return %c0_i32, %c0_i32_0 : i32, i32
  }
  func.func @transform_2(%arg0: i32) -> (i32, i32) {
    %c0_i32 = arith.constant 0 : i32
    %c0_i32_0 = arith.constant 0 : i32
    %c0_i32_1 = arith.constant 0 : i32
    return %c0_i32, %c0_i32_0 : i32, i32
  }
  func.func @transform_3(%arg0: i32) -> (i32, i32) {
    %c0_i32 = arith.constant 0 : i32
    %c0_i32_0 = arith.constant 0 : i32
    return %arg0, %c0_i32 : i32, i32
  }
}

</mosaic_0001>

<bundles_post_ra>
// kernel: tpu_custom_call.1
= control target key start
LH: loop header
LB: loop body
LE: loop exit
PB: predicated region body
PF: predicated region fallthrough
CT: control target
= control target key end

     0   :  { %8 = vsyncpa [#allocation3], 0  ;;  %s1255_s0 = inlined_call_operand.hbm [shape: f32[8,1024], index: 0, kind: input, shape index: {}]   ;;  %s1256_s1 = inlined_call_operand.hbm [shape: bf16[1024,32], index: 1, kind: input, shape index: {}]   ;;  %s1257_s2 = inlined_call_operand.hbm [shape: f32[2,8], index: 2, kind: input, shape index: {}]   ;;  %s1258_s3 = inlined_call_operand.hbm [shape: f32[2,32], index: 3, kind: output, shape index: {}]  }
   0x1   :  { %9 = vsyncpa [#allocation6], 0 }
   0x2   :  { %10 = vsyncpa [#allocation4], 0  ;;  %s1179_s12 = smov [#allocation5]   ;;  %s1085_s16 = scalar_lea.hbm %s1256_s1, 8192 }
   0x3   :  { %s26_s13 = sshll.u32 %s1179_s12, 4  ;;  %p1086_p0 = scmp.ne.s32.totalorder %s1256_s1, %s1085_s16  ;;  %s27_s13 = int_to_ptr.vmem [resolvable:$true] %s26_s13 }
   0x4   :  { %p1089_p1 = scmp.lt.u32.totalorder %s1085_s16, %s1256_s1 }
   0x6   :  { %p1091_p2 = pnand %p1089_p1, %p1086_p0 }
   0x8   :  { %1094 = shalt.err (!%p1091_p2)
}
   0x9   :  { %s1095_s21 = scalar_lea.vmem %s27_s13, 8192  ;;  %p1100_p4 = scmp.lt.s32.totalorder %s27_s13, %s27_s13 }
   0xa   :  { %p1096_p3 = scmp.ne.s32.totalorder %s27_s13, %s1095_s21  ;;  %p1101_p5 = scmp.lt.s32.totalorder %s1095_s21, %s1095_s21 }
   0xc   :  { %p1102_p6 = por %p1101_p5, %p1100_p4 }
   0xe   :  { %p1103_p7 = pnand %p1102_p6, %p1096_p3 }
  0x10   :  { %1106 = shalt.err (!%p1103_p7)
}
  0x11   :  { %s1180_s22 = smov 64   ;;  %s1181_s23 = smov 4  }
  0x12   :  { %32 = dma.hbm_to_vmem [thread:$0]  %s1256_s1, 8192, %s27_s13, [#allocation6], %s1180_s22, %s1180_s22, %s1181_s23  }
  0x13   :  { %s1182_s26 = smov [#allocation2]   ;;  %s1183_s28 = smov [#allocation7]  }
  0x14   :  { %s17_s27 = sshll.u32 %s1182_s26, 4  ;;  %s39_s29 = sshll.u32 %s1183_s28, 4  ;;  %s18_s27 = int_to_ptr.vmem [resolvable:$true] %s17_s27  ;;  %s40_s29 = int_to_ptr.vmem [resolvable:$true] %s39_s29 }
  0x15   :  { %s1107_s5 = scalar_lea.hbm %s1255_s0, 1024 }
  0x16   :  { %p1108_p8 = scmp.ne.s32.totalorder %s1255_s0, %s1107_s5  ;;  %p1111_p9 = scmp.lt.u32.totalorder %s1107_s5, %s1255_s0 }
  0x18   :  { %p1113_p10 = pnand %p1111_p9, %p1108_p8 }
  0x1a   :  { %1116 = shalt.err (!%p1113_p10)
}
  0x1b   :  { %s1117_s1 = scalar_lea.vmem %s18_s27, 1024  ;;  %p1122_p12 = scmp.lt.s32.totalorder %s18_s27, %s18_s27 }
  0x1c   :  { %p1118_p11 = scmp.ne.s32.totalorder %s18_s27, %s1117_s1  ;;  %p1123_p13 = scmp.lt.s32.totalorder %s1117_s1, %s1117_s1 }
  0x1e   :  { %p1124_p0 = por %p1123_p13, %p1122_p12 }
  0x20   :  { %p1125_p1 = pnand %p1124_p0, %p1118_p11 }
  0x22   :  { %1128 = shalt.err (!%p1125_p1)
}
  0x23   :  { %20 = dma.hbm_to_vmem [thread:$0]  %s1255_s0, 1024, %s18_s27, [#allocation3]  }
  0x24   :  { %s1129_s14 = scalar_lea.hbm %s1257_s2, 32 }
  0x25   :  { %p1130_p2 = scmp.ne.s32.totalorder %s1257_s2, %s1129_s14  ;;  %p1133_p3 = scmp.lt.u32.totalorder %s1129_s14, %s1257_s2 }
  0x27   :  { %p1135_p4 = pnand %p1133_p3, %p1130_p2 }
  0x29   :  { %1138 = shalt.err (!%p1135_p4)
}
  0x2a   :  { %s1139_s19 = scalar_lea.vmem %s40_s29, 32  ;;  %p1144_p6 = scmp.lt.s32.totalorder %s40_s29, %s40_s29 }
  0x2b   :  { %p1140_p5 = scmp.ne.s32.totalorder %s40_s29, %s1139_s19  ;;  %p1145_p7 = scmp.lt.s32.totalorder %s1139_s19, %s1139_s19 }
  0x2d   :  { %p1146_p8 = por %p1145_p7, %p1144_p6 }
  0x2f   :  { %p1147_p9 = pnand %p1146_p8, %p1140_p5 }
  0x31   :  { %1150 = shalt.err (!%p1147_p9)
}
  0x32   :  { %42 = dma.hbm_to_vmem [thread:$0]  %s1257_s2, 32, %s40_s29, [#allocation6]  }
  0x33   :  { %1173 = dma.done.wait [#allocation3], 1024  }
  0x34   :  { %1174 = vsyncadd [#allocation3], 4294966272 }
  0x35   :  { %1175 = dma.done.wait [#allocation6], 8224  }
  0x36   :  { %1176 = vsyncadd [#allocation6], 4294959072  ;;  %v1017_v0 = vld [vmem:[#allocation5 + $0x40] sm:$0xff]   ;;  %v1021_v4 = vld [vmem:[#allocation5 + $0x48] sm:$0xff]   ;;  %vm743_vm0 = vcmask 261120   ;;  %vm1185_vm1 = vmmov 0  }
  0x37   :  { %v1018_v1 = vld [vmem:[#allocation5 + $0xc0] sm:$0xff]   ;;  %914 = vmatprep.subr.bf16.mxu0 %v1017_v0  ;;  %v1022_v5 = vld [vmem:[#allocation5 + $0xc8] sm:$0xff]   ;;  %v1025_v8 = vld [vmem:[#allocation5 + $0x50] sm:$0xff]   ;;  %vm750_vm2 = vcmask 64512   ;;  %vm825_vm3 = vcmask 254976   ;;  %s1186_s2 = smov [#allocation8]  }
  0x38   :  { %v1019_v2 = vld [vmem:[#allocation5] sm:$0xff]   ;;  %936 = vmatprep.subr.bf16.mxu1 %v1018_v1  ;;  %v1023_v6 = vld [vmem:[#allocation5 + $0x8] sm:$0xff]   ;;  %v1026_v9 = vld [vmem:[#allocation5 + $0xd0] sm:$0xff]   ;;  %s839_s21 = sshll.u32 %s1186_s2, 4  ;;  %s840_s21 = int_to_ptr.vmem [resolvable:$true] %s839_s21 }
  0x39   :  { %v1020_v3 = vld [vmem:[#allocation5 + $0x80] sm:$0xff]   ;;  %915 = vmatpush3.bf16.msra.mxu0 %v1019_v2  ;;  %v1024_v7 = vld [vmem:[#allocation5 + $0x88] sm:$0xff]   ;;  %v1027_v10 = vld [vmem:[#allocation5 + $0x10] sm:$0xff]   ;;  %s1151_s22 = scalar_lea.vmem %s840_s21, 32  ;;  %p1156_p11 = scmp.lt.s32.totalorder %s840_s21, %s840_s21 }
  0x3a   :  { %937 = vmatpush3.bf16.msra.mxu1 %v1020_v3  ;;  %916 = vmatprep.subr.bf16.mxu0 %v1021_v4  ;;  %v1028_v11 = vld [vmem:[#allocation5 + $0x90] sm:$0xff]   ;;  %v1029_v12 = vld [vmem:[#allocation5 + $0x58] sm:$0xff]   ;;  %v1033_v16 = vld [vmem:[#allocation5 + $0x60] sm:$0xff]   ;;  %p1152_p10 = scmp.ne.s32.totalorder %s840_s21, %s1151_s22  ;;  %p1157_p12 = scmp.lt.s32.totalorder %s1151_s22, %s1151_s22 }
  0x3b   :  { %938 = vmatprep.subr.bf16.mxu1 %v1022_v5  ;;  %v1030_v13 = vld [vmem:[#allocation5 + $0xd8] sm:$0xff]   ;;  %v1034_v17 = vld [vmem:[#allocation5 + $0xe0] sm:$0xff]   ;;  %v1037_v20 = vld [vmem:[#allocation5 + $0x68] sm:$0xff]  }
  0x3c   :  { %v1031_v14 = vld [vmem:[#allocation5 + $0x18] sm:$0xff]   ;;  %v1035_v18 = vld [vmem:[#allocation5 + $0x20] sm:$0xff]   ;;  %v1038_v21 = vld [vmem:[#allocation5 + $0xe8] sm:$0xff]   ;;  %p1158_p13 = por %p1157_p12, %p1156_p11 }
  0x3d   :  { %917 = vmatpush3.bf16.msra.mxu0 %v1023_v6  ;;  %v1032_v15 = vld [vmem:[#allocation5 + $0x98] sm:$0xff]   ;;  %v1036_v19 = vld [vmem:[#allocation5 + $0xa0] sm:$0xff]   ;;  %v1039_v22 = vld [vmem:[#allocation5 + $0x28] sm:$0xff]  }
  0x3e   :  { %939 = vmatpush3.bf16.msra.mxu1 %v1024_v7  ;;  %918 = vmatprep.subr.bf16.mxu0 %v1025_v8  ;;  %v1040_v23 = vld [vmem:[#allocation5 + $0xa8] sm:$0xff]   ;;  %v1041_v24 = vld [vmem:[#allocation5 + $0x70] sm:$0xff]   ;;  %v1045_v28 = vld [vmem:[#allocation5 + $0x78] sm:$0xff]   ;;  %p1159_p0 = pnand %p1158_p13, %p1152_p10 }
  0x3f   :  { %940 = vmatprep.subr.bf16.mxu1 %v1026_v9  ;;  %v1042_v25 = vld [vmem:[#allocation5 + $0xf0] sm:$0xff]   ;;  %v1046_v29 = vld [vmem:[#allocation5 + $0xf8] sm:$0xff]   ;;  %v54_v32 = vld [vmem:[#allocation2 + $0x8] sm:$0xff] }
  0x40   :  { %v1043_v26 = vld [vmem:[#allocation5 + $0x30] sm:$0xff]   ;;  %v1047_v30 = vld [vmem:[#allocation5 + $0x38] sm:$0xff]   ;;  %v53_v34 = vld [vmem:[#allocation2] sm:$0xff]  ;;  %v62_v35 = vpack.c.bf16 %v54_v32, %v54_v32 }
  0x41   :  { %919 = vmatpush3.bf16.msra.mxu0 %v1027_v10  ;;  %v1044_v27 = vld [vmem:[#allocation5 + $0xb0] sm:$0xff]   ;;  %v1048_v31 = vld [vmem:[#allocation5 + $0xb8] sm:$0xff]   ;;  %v61_v37 = vpack.c.bf16 %v53_v34, %v53_v34  ;;  %v1049_v40 = vld [vmem:[#allocation5 + $0x140] sm:$0xff]  }
  0x42   :  { %941 = vmatpush3.bf16.msra.mxu1 %v1028_v11  ;;  %920 = vmatprep.subr.bf16.mxu0 %v1029_v12  ;;  %v56_v33 = vld [vmem:[#allocation2 + $0x18] sm:$0xff]  ;;  %v55_v38 = vld [vmem:[#allocation2 + $0x10] sm:$0xff]  ;;  %v1050_v41 = vld [vmem:[#allocation5 + $0x1c0] sm:$0xff]  }
  0x43   :  { %942 = vmatprep.subr.bf16.mxu1 %v1030_v13  ;;  %v64_v36 = vpack.c.bf16 %v56_v33, %v56_v33  ;;  %v63_v39 = vpack.c.bf16 %v55_v38, %v55_v38  ;;  %613 = vmatprep.mubr.bf16.mxu0 %v62_v35  ;;  %v1051_v42 = vld [vmem:[#allocation5 + $0x100] sm:$0xff]   ;;  %v1053_v44 = vld [vmem:[#allocation5 + $0x148] sm:$0xff]   ;;  %v1057_v48 = vld [vmem:[#allocation5 + $0x150] sm:$0xff]  }
  0x44   :  { %v1052_v43 = vld [vmem:[#allocation5 + $0x180] sm:$0xff]   ;;  %v1054_v45 = vld [vmem:[#allocation5 + $0x1c8] sm:$0xff]   ;;  %v1058_v49 = vld [vmem:[#allocation5 + $0x1d0] sm:$0xff]  }
  0x45   :  { %921 = vmatpush3.bf16.msra.mxu0 %v1031_v14  ;;  %653 = vmatprep.mubr.bf16.mxu1 %v64_v36  ;;  %v1055_v46 = vld [vmem:[#allocation5 + $0x108] sm:$0xff]   ;;  %v1059_v50 = vld [vmem:[#allocation5 + $0x110] sm:$0xff]   ;;  %v1061_v52 = vld [vmem:[#allocation5 + $0x158] sm:$0xff]  }
  0x46   :  { %943 = vmatpush3.bf16.msra.mxu1 %v1032_v15  ;;  %922 = vmatprep.subr.bf16.mxu0 %v1033_v16  ;;  %v1056_v47 = vld [vmem:[#allocation5 + $0x188] sm:$0xff]   ;;  %v1060_v51 = vld [vmem:[#allocation5 + $0x190] sm:$0xff]   ;;  %v1062_v53 = vld [vmem:[#allocation5 + $0x1d8] sm:$0xff]  }
  0x47   :  { %944 = vmatprep.subr.bf16.mxu1 %v1034_v17  ;;  %v1063_v54 = vld [vmem:[#allocation5 + $0x118] sm:$0xff]   ;;  %v1065_v56 = vld [vmem:[#allocation5 + $0x160] sm:$0xff]   ;;  %v1069_v60 = vld [vmem:[#allocation5 + $0x168] sm:$0xff]  }
  0x48   :  { %v1064_v55 = vld [vmem:[#allocation5 + $0x198] sm:$0xff]   ;;  %v1066_v57 = vld [vmem:[#allocation5 + $0x1e0] sm:$0xff]   ;;  %v1070_v61 = vld [vmem:[#allocation5 + $0x1e8] sm:$0xff]  }
  0x49   :  { %923 = vmatpush3.bf16.msra.mxu0 %v1035_v18  ;;  %v1067_v58 = vld [vmem:[#allocation5 + $0x120] sm:$0xff]   ;;  %v1071_v62 = vld [vmem:[#allocation5 + $0x128] sm:$0xff]   ;;  %v1073_v0 = vld [vmem:[#allocation5 + $0x170] sm:$0xff]  }
  0x4a   :  { %945 = vmatpush3.bf16.msra.mxu1 %v1036_v19  ;;  %924 = vmatprep.subr.bf16.mxu0 %v1037_v20  ;;  %v1068_v59 = vld [vmem:[#allocation5 + $0x1a0] sm:$0xff]   ;;  %v1072_v63 = vld [vmem:[#allocation5 + $0x1a8] sm:$0xff]   ;;  %v1074_v1 = vld [vmem:[#allocation5 + $0x1f0] sm:$0xff]  }
  0x4b   :  { %946 = vmatprep.subr.bf16.mxu1 %v1038_v21  ;;  %v1075_v2 = vld [vmem:[#allocation5 + $0x130] sm:$0xff]   ;;  %v1077_v4 = vld [vmem:[#allocation5 + $0x178] sm:$0xff]   ;;  %v58_v8 = vld [vmem:[#allocation2 + $0x28] sm:$0xff] }
  0x4c   :  { %v1076_v3 = vld [vmem:[#allocation5 + $0x1b0] sm:$0xff]   ;;  %v1078_v5 = vld [vmem:[#allocation5 + $0x1f8] sm:$0xff]   ;;  %v66_v10 = vpack.c.bf16 %v58_v8, %v58_v8  ;;  %v57_v12 = vld [vmem:[#allocation2 + $0x20] sm:$0xff] }
  0x4d   :  { %925 = vmatpush3.bf16.msra.mxu0 %v1039_v22  ;;  %v1079_v6 = vld [vmem:[#allocation5 + $0x138] sm:$0xff]   ;;  %v59_v13 = vld [vmem:[#allocation2 + $0x30] sm:$0xff]  ;;  %v65_v14 = vpack.c.bf16 %v57_v12, %v57_v12 }
  0x4e   :  { %947 = vmatpush3.bf16.msra.mxu1 %v1040_v23  ;;  %926 = vmatprep.subr.bf16.mxu0 %v1041_v24  ;;  %v1080_v7 = vld [vmem:[#allocation5 + $0x1b8] sm:$0xff]   ;;  %v67_v15 = vpack.c.bf16 %v59_v13, %v59_v13 }
  0x4f   :  { %948 = vmatprep.subr.bf16.mxu1 %v1042_v25  ;;  %v60_v9 = vld [vmem:[#allocation2 + $0x38] sm:$0xff] }
  0x50   :  { %v68_v11 = vpack.c.bf16 %v60_v9, %v60_v9 }
  0x51   :  { %927 = vmatpush3.bf16.msra.mxu0 %v1043_v26 }
  0x52   :  { %949 = vmatpush3.bf16.msra.mxu1 %v1044_v27  ;;  %928 = vmatprep.subr.bf16.mxu0 %v1045_v28 }
  0x53   :  { %950 = vmatprep.subr.bf16.mxu1 %v1046_v29 }
  0x55   :  { %929 = vmatpush3.bf16.msra.mxu0 %v1047_v30 }
  0x56   :  { %951 = vmatpush3.bf16.msra.mxu1 %v1048_v31  ;;  %958 = vmatprep.subr.bf16.mxu0 %v1049_v40 }
  0x57   :  { %980 = vmatprep.subr.bf16.mxu1 %v1050_v41  ;;  %v1184_v41 = vmov 0.0  }
  0x58   :  { %614 = vmatmul.mubr.bf16.vlgmr.msra.gmra.mrb[0].mxu0 %v61_v37 }
  0x59   :  { %654 = vmatmul.mubr.bf16.vlgmr.msra.gmra.mrb[0].mxu1 %v63_v39  ;;  %959 = vmatpush3.bf16.msra.mxu0 %v1051_v42 }
  0x5a   :  { %981 = vmatpush3.bf16.msra.mxu1 %v1052_v43  ;;  %960 = vmatprep.subr.bf16.mxu0 %v1053_v44 }
  0x5b   :  { %982 = vmatprep.subr.bf16.mxu1 %v1054_v45  ;;  %693 = vmatprep.mubr.bf16.mxu0 %v66_v10 }
  0x5c   :  { %733 = vmatprep.mubr.bf16.mxu1 %v68_v11 }
  0x5d   :  { %961 = vmatpush3.bf16.msra.mxu0 %v1055_v46  ;;  %v741_v46 = vld [vmem:[#allocation7] sm:$0x3] }
  0x5e   :  { %983 = vmatpush3.bf16.msra.mxu1 %v1056_v47  ;;  %962 = vmatprep.subr.bf16.mxu0 %v1057_v48 }
  0x5f   :  { %984 = vmatprep.subr.bf16.mxu1 %v1058_v49 }
  0x61   :  { %963 = vmatpush3.bf16.msra.mxu0 %v1059_v50 }
  0x62   :  { %985 = vmatpush3.bf16.msra.mxu1 %v1060_v51  ;;  %964 = vmatprep.subr.bf16.mxu0 %v1061_v52 }
  0x63   :  { %986 = vmatprep.subr.bf16.mxu1 %v1062_v53 }
  0x65   :  { %965 = vmatpush3.bf16.msra.mxu0 %v1063_v54 }
  0x66   :  { %987 = vmatpush3.bf16.msra.mxu1 %v1064_v55  ;;  %966 = vmatprep.subr.bf16.mxu0 %v1065_v56 }
  0x67   :  { %988 = vmatprep.subr.bf16.mxu1 %v1066_v57 }
  0x69   :  { %967 = vmatpush3.bf16.msra.mxu0 %v1067_v58 }
  0x6a   :  { %989 = vmatpush3.bf16.msra.mxu1 %v1068_v59  ;;  %968 = vmatprep.subr.bf16.mxu0 %v1069_v60 }
  0x6b   :  { %990 = vmatprep.subr.bf16.mxu1 %v1070_v61 }
  0x6d   :  { %969 = vmatpush3.bf16.msra.mxu0 %v1071_v62 }
  0x6e   :  { %991 = vmatpush3.bf16.msra.mxu1 %v1072_v63  ;;  %970 = vmatprep.subr.bf16.mxu0 %v1073_v0 }
  0x6f   :  { %992 = vmatprep.subr.bf16.mxu1 %v1074_v1 }
  0x71   :  { %971 = vmatpush3.bf16.msra.mxu0 %v1075_v2 }
  0x72   :  { %993 = vmatpush3.bf16.msra.mxu1 %v1076_v3  ;;  %972 = vmatprep.subr.bf16.mxu0 %v1077_v4 }
  0x73   :  { %994 = vmatprep.subr.bf16.mxu1 %v1078_v5 }
  0x75   :  { %973 = vmatpush3.bf16.msra.mxu0 %v1079_v6 }
  0x76   :  { %995 = vmatpush3.bf16.msra.mxu1 %v1080_v7  ;;  %1004 = vmatprep.subr.mxu0 %v1184_v41 }
  0x78   :  { %694 = vmatmul.mubr.bf16.vlgmr.msra.gmra.mrb[4].mxu0 %v65_v14 }
  0x79   :  { %734 = vmatmul.mubr.bf16.vlgmr.msra.gmra.mrb[4].mxu1 %v67_v15  ;;  %1006 = vmatprep.mubr.msk.f32.mxu0 %vm1185_vm1, %v1184_v41 }
 0x12b   :  { %v930_v16 = vpop.f32.mrb[0].mxu0 }
 0x12c   :  { %v952_v17 = vpop.f32.mrb[0].mxu1  ;;  %v931_v18 = vpop.f32.mrb[1].mxu0 }
 0x12d   :  { %v953_v19 = vpop.f32.mrb[1].mxu1  ;;  %v932_v20 = vadd.f32 %v931_v18, %v930_v16  ;;  %v933_v22 = vpop.f32.mrb[2].mxu0 }
 0x12e   :  { %v954_v21 = vadd.f32 %v953_v19, %v952_v17  ;;  %v955_v23 = vpop.f32.mrb[2].mxu1  ;;  %v934_v24 = vpop.f32.mrb[3].mxu0 }
 0x12f   :  { %v956_v25 = vpop.f32.mrb[3].mxu1 }
 0x130   :  { %v656_v26 = vadd.f32 %v954_v21, %v932_v20 }
 0x14b   :  { %v974_v27 = vpop.f32.mrb[4].mxu0 }
 0x14c   :  { %v996_v28 = vpop.f32.mrb[4].mxu1  ;;  %v975_v29 = vpop.f32.mrb[5].mxu0 }
 0x14d   :  { %v976_v30 = vadd.f32 %v975_v29, %v974_v27  ;;  %v997_v31 = vpop.f32.mrb[5].mxu1  ;;  %v977_v32 = vpop.f32.mrb[6].mxu0 }
 0x14e   :  { %v998_v33 = vadd.f32 %v997_v31, %v996_v28  ;;  %v999_v34 = vpop.f32.mrb[6].mxu1  ;;  %v978_v35 = vpop.f32.mrb[7].mxu0 }
 0x14f   :  { %v696_v36 = vadd.f32 %v976_v30, %v656_v26  ;;  %v1000_v37 = vpop.f32.mrb[7].mxu1 }
 0x151   :  { %v736_v38 = vadd.f32 %v998_v33, %v696_v36 }
 0x153   :  { %v742_v39 = vmul.f32 %v736_v38, %v736_v38 }
 0x155   :  { %v744_v40 = vsel %vm743_vm0, %v742_v39, 0.0 }
 0x156   :  { %745 = vadd.xlane.f32.xlu0 %v744_v40 }
 0x1e3   :  { %v746_v42 = vpop.xlane.xlu0 %745 }
 0x1e4   :  { %v747_v43 = vadd.f32 1e-12, %v746_v42 }
 0x1e6   :  { %1081 = vrsqrt.f32 %v747_v43 }
 0x1f0   :  { %v1082_v44 = vpop.eup %1081 }
 0x1f1   :  { %v749_v45 = vmul.f32 %v1082_v44, %v736_v38 }
 0x1f3   :  { %1005 = vmatpush3.msra.mxu0 %v749_v45 }
 0x1f4   :  { %1007 = vmatmul.mubr.msk.f32.vlgmr.msra.gmra.mrb[8].mxu0 %vm750_vm2, %v741_v46 }
 0x2c7   :  { %v820_v47 = vpop.f32.mrb[8].mxu0 }
 0x2c8   :  { %v824_v48 = vmul.f32 %v820_v47, %v820_v47  ;;  %v1008_v49 = vpop.f32.mrb[9].mxu0 }
 0x2ca   :  { %v826_v50 = vsel %vm825_vm3, %v824_v48, 0.0 }
 0x2cb   :  { %827 = vadd.xlane.f32.xlu0 %v826_v50 }
 0x358   :  { %v828_v51 = vpop.xlane.xlu0 %827 }
 0x359   :  { %v829_v52 = vadd.f32 1e-12, %v828_v51 }
 0x35b   :  { %1083 = vrsqrt.f32 %v829_v52 }
 0x365   :  { %v1084_v53 = vpop.eup %1083 }
 0x366   :  { %v831_v54 = vmul.f32 %v1084_v53, %v820_v47 }
 0x368   :  { %832 = vst.msk [vmem:[#allocation8] sm:$0x3] %vm825_vm3, %v831_v54 }
 0x369   :  { %1162 = shalt.err (!%p1159_p0)
}
 0x36a   :  { %s1163_s25 = scalar_lea.hbm %s1258_s3, 32 }
 0x36b   :  { %p1164_p1 = scmp.ne.s32.totalorder %s1258_s3, %s1163_s25  ;;  %p1167_p2 = scmp.lt.u32.totalorder %s1163_s25, %s1258_s3 }
 0x36d   :  { %p1169_p3 = pnand %p1167_p2, %p1164_p1 }
 0x36f   :  { %1172 = shalt.err (!%p1169_p3)
}
 0x370   :  { %842 = dma.vmem_to_hbm [thread:$0]  %s840_s21, 32, %s1258_s3, [#allocation4]  }
 0x371   :  { %1177 = dma.done.wait [#allocation4], 32  }
 0x372   :  { %1178 = vsyncadd [#allocation4], 4294967264 }
 0x373   :  { %846 = vsyncpa [#allocation3], 1 }
 0x374   :  { %847 = vsyncpa [#allocation6], 1 }
 0x375   :  { %848 = vsyncpa [#allocation4], 1 }

</bundles_post_ra>
